<compile_context>
chip_gen: v7x
topology: tpu7x:2x2x1
jax: 0.10.0
libtpu: 0.0.40
codegen_flags: <defaults>
</compile_context>

<pallas_src>
import jax
import jax.numpy as jnp
from jax.experimental import pallas as pl
from jax.experimental.pallas import tpu as pltpu


def _round_up(x, m):
    return ((x + m - 1) // m) * m


def _choose_tile_rows(n, c, dtype, per_buffer_budget=2 * 1024 * 1024):
    """Rows per tile: ~2 MiB of *actual* (lane-padded) VMEM per buffer, sublane-aligned."""
    elem_bytes = jnp.dtype(dtype).itemsize
    sub = max(8, 32 // elem_bytes)              # sublane tile: 8 (f32) / 16 (bf16) / 32 (int8)
    c_pad = _round_up(c, 128)                   # lanes pad to 128 in VMEM
    # probs row (lane-padded) + targets row (a (TN,1) i32 block pads to (TN,128) in VMEM).
    bytes_per_row = c_pad * elem_bytes + 128 * 4
    tn = per_buffer_budget // max(bytes_per_row, 1)
    tn = min(int(tn), 2048)                     # HBM roofline saturates well below this
    tn = min(tn, _round_up(n, sub))             # no point exceeding the batch
    tn = max(sub, (tn // sub) * sub)            # sublane-aligned
    return tn


def _make_ce_kernel(n_valid, tile_rows, tiles_per_slice):
    """n_valid: true batch size; tile_rows: rows per grid step; tiles_per_slice: inner extent."""

    def kernel(outputs_ref, targets_ref, out_ref, acc_ref):
        s = pl.program_id(0)                    # batch slice (parallel; megacore on v7x)
        i = pl.program_id(1)                    # batch tile within slice (reduction)

        @pl.when(i == 0)
        def _init():
            acc_ref[...] = jnp.zeros_like(acc_ref)

        probs = outputs_ref[...]                # [TN, C] native dtype (f32 / bf16 / ...)
        tgt = targets_ref[...]                  # [TN, 1] int32
        tn, c = probs.shape

        # Hot [TN, C] pass: iota-compare + select + lane reduce (VPU/XLU only, no extra casts).
        col = jax.lax.broadcasted_iota(jnp.int32, (tn, c), 1)
        onehot = col == tgt
        picked = jnp.sum(jnp.where(onehot, probs, jnp.zeros_like(probs)),
                         axis=1, keepdims=True).astype(jnp.float32)      # [TN, 1] f32

        # Cheap [TN, 1] pass: mask ragged-last-tile / clamped-duplicate rows before log + sum.
        tile_idx = s * tiles_per_slice + i       # *un-clamped* global tile index
        row = tile_idx * tile_rows + jax.lax.broadcasted_iota(jnp.int32, (tn, 1), 0)
        valid = row < n_valid
        safe = jnp.where(valid, picked, jnp.ones_like(picked))           # keep log() finite
        logp = jnp.log(safe + jnp.float32(1e-7))                         # EUP
        acc_ref[...] += jnp.sum(jnp.where(valid, logp, jnp.zeros_like(logp)))

        @pl.when(i == pl.num_programs(1) - 1)
        def _finalize():
            out_ref[...] = acc_ref[...].reshape(1, 1, 1)

    return kernel


def cross_entropy_loss(outputs, targets, tile_rows=None):
    """outputs: [N, C] probabilities (any float dtype), targets: [N] ints -> scalar f32 loss."""
    n, c = outputs.shape
    targets2d = targets.astype(jnp.int32).reshape(n, 1)
    elem_bytes = jnp.dtype(outputs.dtype).itemsize
    sub = max(8, 32 // elem_bytes)

    if tile_rows is None:
        tn = _choose_tile_rows(n, c, outputs.dtype)
    else:
        tn = max(sub, (int(tile_rows) // sub) * sub)

    num_tiles = pl.cdiv(n, tn)
    slices = 2 if num_tiles >= 2 else 1          # lets megacore (v7x) split the batch
    tiles_per_slice = pl.cdiv(num_tiles, slices)
    last_tile = num_tiles - 1

    # Clamp the block index so the duplicate tail tile (odd tile count) never DMAs out of
    # bounds; the kernel's row mask (from the *un-clamped* index) zeroes its contribution.
    def in_map(s, i):
        return (jnp.minimum(s * tiles_per_slice + i, last_tile), 0)

    partials = pl.pallas_call(
        _make_ce_kernel(n, tn, tiles_per_slice),
        out_shape=jax.ShapeDtypeStruct((slices, 1, 1), jnp.float32),
        grid=(slices, tiles_per_slice),
        in_specs=[
            pl.BlockSpec((tn, c), in_map),       # [TN, C] probabilities, native dtype
            pl.BlockSpec((tn, 1), in_map),       # [TN, 1] targets (pads to 128 lanes in VMEM)
        ],
        out_specs=pl.BlockSpec((1, 1, 1), lambda s, i: (s, 0, 0)),
        scratch_shapes=[pltpu.VMEM((1, 1), jnp.float32)],   # per-slice running sum
        compiler_params=pltpu.CompilerParams(
            dimension_semantics=("parallel", "arbitrary"),
            vmem_limit_bytes=24 * 1024 * 1024,
        ),
        cost_estimate=pl.CostEstimate(
            flops=3 * n * c,
            transcendentals=n,
            bytes_accessed=n * c * elem_bytes + n * 4 + slices * 4,
        ),
    )(outputs, targets2d)

    # reduction='mean' over the true batch size.
    return -jnp.sum(partials) / jnp.float32(n)


def _reference(outputs, targets):
    eps = 1e-7
    picked = jnp.take_along_axis(outputs, targets[:, None].astype(jnp.int32), axis=1)
    return -jnp.mean(jnp.log(picked.astype(jnp.float32) + eps))


if __name__ == "__main__":
    key = jax.random.PRNGKey(0)
    k1, k2, k3, k4 = jax.random.split(key, 4)

    # Small test at the module-implied shape (softmax-style probability outputs), f32.
    N, C = 8, 16
    probs = jax.nn.softmax(jax.random.normal(k1, (N, C), dtype=jnp.float32), axis=-1)
    targets = jax.random.randint(k2, (N,), 0, C, dtype=jnp.int32)
    loss = cross_entropy_loss(probs, targets)
    jax.block_until_ready(loss)
    ref = _reference(probs, targets)
    assert jnp.allclose(loss, ref, atol=1e-5, rtol=1e-5), (loss, ref)

    # Larger test: bf16 native-dtype reads, multiple tiles, two slices with an odd tile count
    # (exercises the clamped duplicate tail tile) and a partial last block (1000 % 112 != 0).
    N2, C2 = 1000, 256
    probs2 = jax.nn.softmax(
        jax.random.normal(k3, (N2, C2), dtype=jnp.float32), axis=-1).astype(jnp.bfloat16)
    targets2 = jax.random.randint(k4, (N2,), 0, C2, dtype=jnp.int32)
    loss2 = cross_entropy_loss(probs2, targets2, tile_rows=112)
    jax.block_until_ready(loss2)
    ref2 = _reference(probs2, targets2)
    assert jnp.allclose(loss2, ref2, atol=2e-4, rtol=2e-4), (loss2, ref2)

    print("KERNEL_OK")
</pallas_src>

<mosaic_0001>
module attributes {stable_mosaic.version = 11 : i64} {
  func.func @kernel(%arg0: i32, %arg1: i32, %arg2: memref<8x16xf32, #tpu.memory_space<vmem>>, %arg3: memref<8x1xi32, #tpu.memory_space<vmem>>, %arg4: memref<1x1x1xf32, #tpu.memory_space<vmem>>, %arg5: memref<1x1xf32, #tpu.memory_space<vmem>>) attributes {dimension_semantics = [#tpu.dimension_semantics<parallel>, #tpu.dimension_semantics<arbitrary>], iteration_bounds = array<i64: 1, 1>, scalar_prefetch = 0 : i64, scratch_operands = 1 : i64, tpu.core_type = #tpu.core_type<tc>, window_params = [{transform_indices = @transform_0, window_bounds = array<i64: 8, 16>}, {transform_indices = @transform_1, window_bounds = array<i64: 8, 1>}, {transform_indices = @transform_2, window_bounds = array<i64: 1, 1, 1>}]} {
    %c0_i32 = arith.constant 0 : i32
    %0 = arith.cmpi eq, %arg1, %c0_i32 : i32
    %1 = arith.extui %0 : i1 to i32
    %c0_i32_0 = arith.constant 0 : i32
    %2 = arith.cmpi ne, %1, %c0_i32_0 : i32
    scf.if %2 {
      %cst_16 = arith.constant 0.000000e+00 : f32
      %38 = vector.broadcast %cst_16 : f32 to vector<1x1xf32>
      %c0_17 = arith.constant 0 : index
      %c0_18 = arith.constant 0 : index
      %39 = vector.load %arg5[%c0_17, %c0_18] : memref<1x1xf32, #tpu.memory_space<vmem>>, vector<1x1xf32>
      tpu.vector_store %arg5[%c0_17, %c0_18], %38 {strides = array<i32>} : memref<1x1xf32, #tpu.memory_space<vmem>>, vector<1x1xf32>,
    } else {
    }
    %c0 = arith.constant 0 : index
    %c0_1 = arith.constant 0 : index
    %3 = vector.load %arg2[%c0, %c0_1] : memref<8x16xf32, #tpu.memory_space<vmem>>, vector<8x16xf32>
    %c0_2 = arith.constant 0 : index
    %c0_3 = arith.constant 0 : index
    %4 = vector.load %arg3[%c0_2, %c0_3] : memref<8x1xi32, #tpu.memory_space<vmem>>, vector<8x1xi32>
    %5 = tpu.iota {dimensions = array<i32: 1>} : vector<8x16xi32>
    %6 = vector.broadcast %4 : vector<8x1xi32> to vector<8x16xi32>
    %7 = arith.cmpi eq, %5, %6 : vector<8x16xi32>
    %cst = arith.constant 0.000000e+00 : f32
    %8 = vector.broadcast %cst : f32 to vector<8x16xf32>
    %9 = arith.select %7, %3, %8 : vector<8x16xi1>, vector<8x16xf32>
    %cst_4 = arith.constant dense<0.000000e+00> : vector<8xf32>
    %10 = vector.multi_reduction <add>, %9, %cst_4 [1] : vector<8x16xf32> to vector<8xf32>
    %11 = vector.shape_cast %10 : vector<8xf32> to vector<8x1xf32>
    %c1_i32 = arith.constant 1 : i32
    %12 = arith.muli %arg0, %c1_i32 : i32
    %13 = arith.addi %12, %arg1 : i32
    %c8_i32 = arith.constant 8 : i32
    %14 = arith.muli %13, %c8_i32 : i32
    %15 = tpu.iota {dimensions = array<i32: 0>} : vector<8x1xi32>
    %16 = vector.broadcast %14 : i32 to vector<8x1xi32>
    %17 = arith.addi %16, %15 : vector<8x1xi32>
    %c8_i32_5 = arith.constant 8 : i32
    %18 = vector.broadcast %c8_i32_5 : i32 to vector<8x1xi32>
    %19 = arith.cmpi slt, %17, %18 : vector<8x1xi32>
    %cst_6 = arith.constant 1.000000e+00 : f32
    %20 = vector.broadcast %cst_6 : f32 to vector<8x1xf32>
    %21 = arith.select %19, %11, %20 : vector<8x1xi1>, vector<8x1xf32>
    %cst_7 = arith.constant 1.000000e-07 : f32
    %22 = vector.broadcast %cst_7 : f32 to vector<8x1xf32>
    %23 = arith.addf %21, %22 : vector<8x1xf32>
    %24 = math.log %23 : vector<8x1xf32>
    %c0_8 = arith.constant 0 : index
    %c0_9 = arith.constant 0 : index
    %25 = vector.load %arg5[%c0_8, %c0_9] : memref<1x1xf32, #tpu.memory_space<vmem>>, vector<1x1xf32>
    %cst_10 = arith.constant 0.000000e+00 : f32
    %26 = vector.broadcast %cst_10 : f32 to vector<8x1xf32>
    %27 = arith.select %19, %24, %26 : vector<8x1xi1>, vector<8x1xf32>
    %28 = vector.shape_cast %27 : vector<8x1xf32> to vector<1x8x1xf32>
    %cst_11 = arith.constant dense<0.000000e+00> : vector<1xf32>
    %29 = vector.multi_reduction <add>, %28, %cst_11 [1, 2] : vector<1x8x1xf32> to vector<1xf32>
    %30 = vector.shape_cast %29 : vector<1xf32> to vector<1x1x1xf32>
    %31 = vector.extract %30[0, 0, 0] : f32 from vector<1x1x1xf32>
    %32 = vector.broadcast %31 : f32 to vector<1x1xf32>
    %33 = arith.addf %25, %32 : vector<1x1xf32>
    %c0_12 = arith.constant 0 : index
    %c0_13 = arith.constant 0 : index
    %34 = vector.load %arg5[%c0_12, %c0_13] : memref<1x1xf32, #tpu.memory_space<vmem>>, vector<1x1xf32>
    tpu.vector_store %arg5[%c0_12, %c0_13], %33 {strides = array<i32>} : memref<1x1xf32, #tpu.memory_space<vmem>>, vector<1x1xf32>,
    %c0_i32_14 = arith.constant 0 : i32
    %35 = arith.cmpi eq, %arg1, %c0_i32_14 : i32
    %36 = arith.extui %35 : i1 to i32
    %c0_i32_15 = arith.constant 0 : i32
    %37 = arith.cmpi ne, %36, %c0_i32_15 : i32
    scf.if %37 {
      %c0_16 = arith.constant 0 : index
      %c0_17 = arith.constant 0 : index
      %38 = vector.load %arg5[%c0_16, %c0_17] : memref<1x1xf32, #tpu.memory_space<vmem>>, vector<1x1xf32>
      %39 = vector.shape_cast %38 : vector<1x1xf32> to vector<1x1x1xf32>
      %c0_18 = arith.constant 0 : index
      %c0_19 = arith.constant 0 : index
      %c0_20 = arith.constant 0 : index
      %40 = vector.load %arg4[%c0_18, %c0_19, %c0_20] : memref<1x1x1xf32, #tpu.memory_space<vmem>>, vector<1x1x1xf32>
      tpu.vector_store %arg4[%c0_18, %c0_19, %c0_20], %39 {strides = array<i32>} : memref<1x1x1xf32, #tpu.memory_space<vmem>>, vector<1x1x1xf32>,
    } else {
    }
    return
  }
  func.func @transform_0(%arg0: i32, %arg1: i32) -> (i32, i32) {
    %c1_i32 = arith.constant 1 : i32
    %0 = arith.muli %arg0, %c1_i32 : i32
    %1 = arith.addi %0, %arg1 : i32
    %c0_i32 = arith.constant 0 : i32
    %2 = arith.minsi %1, %c0_i32 : i32
    %c0_i32_0 = arith.constant 0 : i32
    %c0_i32_1 = arith.constant 0 : i32
    return %2, %c0_i32_0 : i32, i32
  }
  func.func @transform_1(%arg0: i32, %arg1: i32) -> (i32, i32) {
    %c1_i32 = arith.constant 1 : i32
    %0 = arith.muli %arg0, %c1_i32 : i32
    %1 = arith.addi %0, %arg1 : i32
    %c0_i32 = arith.constant 0 : i32
    %2 = arith.minsi %1, %c0_i32 : i32
    %c0_i32_0 = arith.constant 0 : i32
    %c0_i32_1 = arith.constant 0 : i32
    return %2, %c0_i32_0 : i32, i32
  }
  func.func @transform_2(%arg0: i32, %arg1: i32) -> (i32, i32, i32) {
    %c0_i32 = arith.constant 0 : i32
    %c0_i32_0 = arith.constant 0 : i32
    %c0_i32_1 = arith.constant 0 : i32
    return %arg0, %c0_i32, %c0_i32_0 : i32, i32, i32
  }
}

</mosaic_0001>

<bundles_post_ra>
// kernel: tpu_custom_call.1
= control target key start
LH: loop header
LB: loop body
LE: loop exit
PB: predicated region body
PF: predicated region fallthrough
CT: control target
= control target key end

     0   :  { %s215_s0 = inlined_call_operand.vmem [shape: f32[8,16], index: 0, kind: input, shape index: {}]   ;;  %s216_s1 = inlined_call_operand.vmem [shape: s32[8,1], index: 1, kind: input, shape index: {}]   ;;  %s217_s2 = inlined_call_operand.hbm [shape: f32[1,1,1], index: 2, kind: output, shape index: {}]  }
   0x1   :  { %v73_v0 = vld [vmem:[%s216_s1] sm:$0xff] }
   0x2   :  { %7 = vsyncpa [#allocation4], 0  ;;  %v176_v1 = vmov 0   ;;  %v74_v2 = vlaneseq  ;;  %v72_v4 = vld [vmem:[%s215_s0] sm:$0xff]  ;;  %vm81_vm0 = vcmask 130048   ;;  %vm98_vm2 = vcmask 7168  }
   0x3   :  { %149 = vset.pattern.permute.xlu0 %v176_v1  ;;  %vm70_vm3 = vcmask 0   ;;  %v177_v13 = vmov 0.0   ;;  %s178_s1 = smov [#allocation3]  }
   0x4   :  { %77 = vperm.xlu0 %149, %v73_v0   ;;  %v75_v3 = vand.u32 127, %v74_v2  ;;  %71 = vst.msk [vmem:[#allocation2] sm:$0x1] %vm70_vm3, %v177_v13  ;;  %s124_s13 = sshll.u32 %s178_s1, 4  ;;  %s125_s13 = int_to_ptr.vmem [resolvable:$true] %s124_s13 }
   0x5   :  { %s152_s14 = scalar_lea.vmem %s125_s13, 16  ;;  %s156_s15 = scalar_lea.vmem %s125_s13, 32 }
   0x6   :  { %p153_p0 = scmp.ne.s32.totalorder %s125_s13, %s152_s14  ;;  %p157_p1 = scmp.lt.s32.totalorder %s125_s13, %s125_s13 }
   0x7   :  { %p158_p2 = scmp.lt.s32.totalorder %s156_s15, %s152_s14 }
   0x9   :  { %p159_p3 = por %p158_p2, %p157_p1 }
   0xb   :  { %v96_v21 = vld [vmem:[#allocation2] sm:$0x1]  ;;  %p160_p4 = pnand %p159_p3, %p153_p0 }
  0x83   :  { %v78_v5 = vpop.permute.xlu0 %77 }
  0x84   :  { %vm79_vm1 = vcmp.eq.s32.totalorder %v75_v3, %v78_v5 }
  0x85   :  { %v80_v6 = vsel %vm79_vm1, %v72_v4, 0.0 }
  0x86   :  { %v82_v7 = vsel %vm81_vm0, %v80_v6, 0.0 }
  0x87   :  { %83 = vadd.xlane.f32.xlu0 %v82_v7 }
 0x114   :  { %v84_v8 = vpop.xlane.xlu0 %83 }
 0x115   :  { %v93_v9 = vadd.f32 1e-07, %v84_v8 }
 0x117   :  { %150 = vlog2.f32 %v93_v9 }
 0x121   :  { %v151_v10 = vpop.eup %150 }
 0x122   :  { %v95_v11 = vmul.f32 0.6931472, %v151_v10 }
 0x124   :  { %v99_v12 = vsel %vm98_vm2, %v95_v11, 0.0 }
 0x125   :  { %100 = vadd.xlane.f32.xlu1 %v99_v12 }
 0x1b2   :  { %v101_v14 = vpop.xlane.xlu1 %100 }
 0x1b3   :  { %v102_v15 = vrot.slane %v101_v14, 4 }
 0x1b5   :  { %v103_v16 = vadd.f32 %v102_v15, %v101_v14 }
 0x1b7   :  { %v104_v17 = vrot.slane %v103_v16, 2 }
 0x1b9   :  { %v105_v18 = vadd.f32 %v104_v17, %v103_v16 }
 0x1bb   :  { %v106_v19 = vrot.slane %v105_v18, 1 }
 0x1bd   :  { %v107_v20 = vadd.f32 %v106_v19, %v105_v18 }
 0x1bf   :  { %144 = vpush %v107_v20 }
 0x1f0   :  { %s145_s0 = spop %144 }
 0x1f1   :  { %v109_v22 = vstv %s145_s0 }
 0x1f2   :  { %v110_v23 = vadd.f32 %v109_v22, %v96_v21 }
 0x1f4   :  { %112 = vst.msk [vmem:[#allocation2] sm:$0x1] %vm70_vm3, %v110_v23 }
 0x1fb   :  { %v116_v24 = vld [vmem:[#allocation2] sm:$0x1] }
 0x1fc   :  { %117 = vst.msk [vmem:[#allocation3] sm:$0x1] %vm70_vm3, %v116_v24 }
 0x1fd   :  { %163 = shalt.err (!%p160_p4)
}
 0x1fe   :  { %s164_s18 = scalar_lea.hbm %s217_s2, 16 }
 0x1ff   :  { %p165_p5 = scmp.ne.s32.totalorder %s217_s2, %s164_s18  ;;  %p168_p6 = scmp.lt.u32.totalorder %s164_s18, %s217_s2 }
 0x201   :  { %p170_p7 = pnand %p168_p6, %p165_p5 }
 0x203   :  { %173 = shalt.err (!%p170_p7)
}
 0x204   :  { %127 = dma.vmem_to_hbm [thread:$0]  %s125_s13, 16, %s217_s2, [#allocation4]  }
 0x205   :  { %174 = dma.done.wait [#allocation4], 16  }
 0x206   :  { %175 = vsyncadd [#allocation4], 4294967280 }
 0x207   :  { %131 = vsyncpa [#allocation4], 1 }

</bundles_post_ra>
